<compile_context>
chip_gen: v7x
topology: tpu7x:2x2x1
jax: 0.10.0
libtpu: 0.0.40
codegen_flags: <defaults>
</compile_context>

<pallas_src>
import jax
import jax.numpy as jnp
from jax.experimental import pallas as pl
from jax.experimental.pallas import tpu as pltpu


def _lelu_auto_kernel(ab_ref, x_ref, o_ref):
    # ab_ref: (2,) f32 in SMEM holding [a, b]
    a = ab_ref[0]
    b = ab_ref[1]
    x = x_ref[...].astype(jnp.float32)
    t = a * x + b                      # a*x + b
    s = b - a * x                      # -a*x + b
    sp_pos = jnp.logaddexp(t, 0.0)     # softplus(a*x + b), numerically stable
    sp_neg = jnp.logaddexp(s, 0.0)     # softplus(-a*x + b)
    u = x * sp_pos
    v = sp_neg + sp_pos                # strictly positive
    o_ref[...] = (u / v).astype(o_ref.dtype)


def _choose_width(n):
    """Pick the widest lane-multiple that divides n (avoids any pad/copy)."""
    for w in (1024, 512, 256, 128):
        if n % w == 0:
            return w, 0
    return 128, (-n) % 128             # tiny pad (< 128 elements)


def lelu_auto(x, a=1.0, b=0.0, *, target_block_bytes=2 * 1024 * 1024):
    """LELUAuto forward, elementwise over any shape (e.g. NCHW)."""
    orig_shape = x.shape
    orig_dtype = x.dtype
    n = x.size

    W, pad = _choose_width(n)
    xf = x.reshape(-1)
    if pad:
        xf = jnp.pad(xf, (0, pad))
    rows = xf.size // W
    x2d = xf.reshape(rows, W)

    itemsize = jnp.dtype(orig_dtype).itemsize
    # ~2 MiB per block buffer; multiple of 16 rows (covers f32 and bf16 tiling).
    block_rows = max(16, (target_block_bytes // (W * itemsize)) // 16 * 16)
    if rows <= block_rows:
        block_rows = rows              # block == full first dim (always legal)
    grid = (pl.cdiv(rows, block_rows),)

    ab = jnp.asarray([a, b], dtype=jnp.float32).reshape(2)

    out2d = pl.pallas_call(
        _lelu_auto_kernel,
        out_shape=jax.ShapeDtypeStruct((rows, W), orig_dtype),
        grid_spec=pltpu.PrefetchScalarGridSpec(
            num_scalar_prefetch=0,
            grid=grid,
            in_specs=[
                pl.BlockSpec(memory_space=pltpu.MemorySpace.SMEM),  # [a, b]
                pl.BlockSpec((block_rows, W), lambda i: (i, 0)),
            ],
            out_specs=pl.BlockSpec((block_rows, W), lambda i: (i, 0)),
        ),
        compiler_params=pltpu.CompilerParams(
            dimension_semantics=("parallel",),
            vmem_limit_bytes=32 * 1024 * 1024,
        ),
    )(ab, x2d)

    out = out2d.reshape(-1)
    if pad:
        out = out[:n]
    return out.reshape(orig_shape)


def _reference(x, a, b):
    sp_pos = jnp.logaddexp(a * x + b, 0.0)
    sp_neg = jnp.logaddexp(-a * x + b, 0.0)
    return (x * sp_pos) / (sp_neg + sp_pos)


if __name__ == "__main__":
    key = jax.random.PRNGKey(0)
    a, b = 1.0, 0.0                      # module parameter defaults

    # NCHW input, typical conv-activation shape.
    x = jax.random.normal(key, (2, 4, 16, 16), dtype=jnp.float32) * 3.0
    y = lelu_auto(x, a, b)
    jax.block_until_ready(y)
    assert y.shape == x.shape and y.dtype == x.dtype
    assert jnp.max(jnp.abs(y - _reference(x, a, b))) < 1e-4

    # Exercise the ragged / pad path with a size not divisible by 128.
    x2 = jax.random.normal(jax.random.PRNGKey(1), (3, 5, 7), dtype=jnp.float32)
    y2 = lelu_auto(x2, a, b)
    jax.block_until_ready(y2)
    assert y2.shape == x2.shape
    assert jnp.max(jnp.abs(y2 - _reference(x2, a, b))) < 1e-4

    # TODO(synk): backward pass (custom autograd.Function) not implemented;
    # forward only, matching the requested forward-pass semantics.
    print("KERNEL_OK")
</pallas_src>

<mosaic_0001>
module attributes {stable_mosaic.version = 11 : i64} {
  func.func @_lelu_auto_kernel(%arg0: i32, %arg1: memref<2xf32, #tpu.memory_space<smem>>, %arg2: memref<2x1024xf32, #tpu.memory_space<vmem>>, %arg3: memref<2x1024xf32, #tpu.memory_space<vmem>>) attributes {dimension_semantics = [#tpu.dimension_semantics<parallel>], iteration_bounds = array<i64: 1>, scalar_prefetch = 0 : i64, scratch_operands = 0 : i64, tpu.core_type = #tpu.core_type<tc>, window_params = [{transform_indices = @transform_0, window_bounds = array<i64: 2>}, {transform_indices = @transform_1, window_bounds = array<i64: 2, 1024>}, {transform_indices = @transform_2, window_bounds = array<i64: 2, 1024>}]} {
    %c0 = arith.constant 0 : index
    %0 = memref.load %arg1[%c0] : memref<2xf32, #tpu.memory_space<smem>>
    %c1 = arith.constant 1 : index
    %1 = memref.load %arg1[%c1] : memref<2xf32, #tpu.memory_space<smem>>
    %c0_0 = arith.constant 0 : index
    %c0_1 = arith.constant 0 : index
    %2 = vector.load %arg2[%c0_0, %c0_1] : memref<2x1024xf32, #tpu.memory_space<vmem>>, vector<2x1024xf32>
    %3 = vector.broadcast %0 : f32 to vector<2x1024xf32>
    %4 = arith.mulf %3, %2 : vector<2x1024xf32>
    %5 = vector.broadcast %1 : f32 to vector<2x1024xf32>
    %6 = arith.addf %4, %5 : vector<2x1024xf32>
    %7 = vector.broadcast %0 : f32 to vector<2x1024xf32>
    %8 = arith.mulf %7, %2 : vector<2x1024xf32>
    %9 = vector.broadcast %1 : f32 to vector<2x1024xf32>
    %10 = arith.subf %9, %8 : vector<2x1024xf32>
    %cst = arith.constant 0.000000e+00 : f32
    %11 = vector.broadcast %cst : f32 to vector<2x1024xf32>
    %12 = arith.maximumf %6, %11 : vector<2x1024xf32>
    %13 = vector.broadcast %cst : f32 to vector<2x1024xf32>
    %14 = arith.subf %6, %13 : vector<2x1024xf32>
    %15 = arith.cmpf one, %14, %14 : vector<2x1024xf32>
    %16 = vector.broadcast %cst : f32 to vector<2x1024xf32>
    %17 = arith.addf %6, %16 : vector<2x1024xf32>
    %18 = math.absf %14 : vector<2x1024xf32>
    %cst_2 = arith.constant 0.000000e+00 : f32
    %19 = vector.broadcast %cst_2 : f32 to vector<2x1024xf32>
    %20 = arith.subf %19, %18 : vector<2x1024xf32>
    %21 = math.exp %20 : vector<2x1024xf32>
    %22 = math.log1p %21 : vector<2x1024xf32>
    %23 = arith.addf %12, %22 : vector<2x1024xf32>
    %24 = arith.select %15, %17, %23 : vector<2x1024xi1>, vector<2x1024xf32>
    %cst_3 = arith.constant 0.000000e+00 : f32
    %25 = vector.broadcast %cst_3 : f32 to vector<2x1024xf32>
    %26 = arith.maximumf %10, %25 : vector<2x1024xf32>
    %27 = vector.broadcast %cst_3 : f32 to vector<2x1024xf32>
    %28 = arith.subf %10, %27 : vector<2x1024xf32>
    %29 = arith.cmpf one, %28, %28 : vector<2x1024xf32>
    %30 = vector.broadcast %cst_3 : f32 to vector<2x1024xf32>
    %31 = arith.addf %10, %30 : vector<2x1024xf32>
    %32 = math.absf %28 : vector<2x1024xf32>
    %cst_4 = arith.constant 0.000000e+00 : f32
    %33 = vector.broadcast %cst_4 : f32 to vector<2x1024xf32>
    %34 = arith.subf %33, %32 : vector<2x1024xf32>
    %35 = math.exp %34 : vector<2x1024xf32>
    %36 = math.log1p %35 : vector<2x1024xf32>
    %37 = arith.addf %26, %36 : vector<2x1024xf32>
    %38 = arith.select %29, %31, %37 : vector<2x1024xi1>, vector<2x1024xf32>
    %39 = arith.mulf %2, %24 : vector<2x1024xf32>
    %40 = arith.addf %38, %24 : vector<2x1024xf32>
    %41 = arith.divf %39, %40 : vector<2x1024xf32>
    %c0_5 = arith.constant 0 : index
    %c0_6 = arith.constant 0 : index
    %42 = vector.load %arg3[%c0_5, %c0_6] : memref<2x1024xf32, #tpu.memory_space<vmem>>, vector<2x1024xf32>
    tpu.vector_store %arg3[%c0_5, %c0_6], %41 {strides = array<i32>} : memref<2x1024xf32, #tpu.memory_space<vmem>>, vector<2x1024xf32>,
    return
  }
  func.func @transform_0(%arg0: i32) -> i32 {
    %c0_i32 = arith.constant 0 : i32
    %c0_i32_0 = arith.constant 0 : i32
    return %c0_i32 : i32
  }
  func.func @transform_1(%arg0: i32) -> (i32, i32) {
    %c0_i32 = arith.constant 0 : i32
    %c0_i32_0 = arith.constant 0 : i32
    return %arg0, %c0_i32 : i32, i32
  }
  func.func @transform_2(%arg0: i32) -> (i32, i32) {
    %c0_i32 = arith.constant 0 : i32
    %c0_i32_0 = arith.constant 0 : i32
    return %arg0, %c0_i32 : i32, i32
  }
}

</mosaic_0001>

<bundles_post_ra>
// kernel: tpu_custom_call.1
= control target key start
LH: loop header
LB: loop body
LE: loop exit
PB: predicated region body
PF: predicated region fallthrough
CT: control target
= control target key end

     0   :  { %7 = vsyncpa [#allocation5], 0  ;;  %s334_s0 = inlined_call_operand.hbm [shape: f32[2], index: 0, kind: input, shape index: {}]   ;;  %s335_s1 = inlined_call_operand.hbm [shape: f32[2,1024], index: 1, kind: input, shape index: {}]   ;;  %s336_s2 = inlined_call_operand.hbm [shape: f32[2,1024], index: 2, kind: output, shape index: {}]  }
   0x1   :  { %8 = vsyncpa [#allocation3], 0 }
   0x2   :  { %9 = vsyncpa [#allocation4], 0  ;;  %s169_s11 = scalar_lea.hbm %s334_s0, 16 }
   0x3   :  { %p170_p0 = scmp.ne.s32.totalorder %s334_s0, %s169_s11  ;;  %p173_p1 = scmp.lt.u32.totalorder %s169_s11, %s334_s0 }
   0x5   :  { %p175_p2 = pnand %p173_p1, %p170_p0 }
   0x7   :  { %178 = shalt.err (!%p175_p2)
}
   0x8   :  { %s229_s16 = smov [#allocation2]   ;;  %s230_s19 = smov [#allocation6]  }
   0x9   :  { %17 = dma.hbm_to_smem %s334_s0, 16, %s229_s16, [#allocation5]  }
   0xa   :  { %s24_s20 = sshll.u32 %s230_s19, 4  ;;  %s179_s23 = scalar_lea.hbm %s335_s1, 256  ;;  %s25_s20 = int_to_ptr.vmem [resolvable:$true] %s24_s20 }
   0xb   :  { %p180_p3 = scmp.ne.s32.totalorder %s335_s1, %s179_s23  ;;  %p183_p4 = scmp.lt.u32.totalorder %s179_s23, %s335_s1 }
   0xd   :  { %p185_p5 = pnand %p183_p4, %p180_p3 }
   0xf   :  { %188 = shalt.err (!%p185_p5)
}
  0x10   :  { %s189_s28 = scalar_lea.vmem %s25_s20, 256  ;;  %p194_p7 = scmp.lt.s32.totalorder %s25_s20, %s25_s20 }
  0x11   :  { %p190_p6 = scmp.ne.s32.totalorder %s25_s20, %s189_s28  ;;  %p195_p8 = scmp.lt.s32.totalorder %s189_s28, %s189_s28 }
  0x13   :  { %p196_p9 = por %p195_p8, %p194_p7 }
  0x15   :  { %p197_p10 = pnand %p196_p9, %p190_p6 }
  0x17   :  { %200 = shalt.err (!%p197_p10)
}
  0x18   :  { %27 = dma.hbm_to_vmem [thread:$0]  %s335_s1, 256, %s25_s20, [#allocation3]  }
  0x19   :  { %223 = dma.done.wait [#allocation5], 16  }
  0x1a   :  { %224 = vsyncadd [#allocation5], 4294967280 }
  0x1b   :  { %225 = dma.done.wait [#allocation3], 256  }
  0x1c   :  { %226 = vsyncadd [#allocation3], 4294967040 }
  0x1d   :  { %34 = sfence }
  0x1e   :  { %s35_s30 = sld [smem:[#allocation2]]  ;;  %s145_s3 = sld [smem:[#allocation2 + $0x1]]  ;;  %v271_v0 = vld [vmem:[#allocation6] sm:$0xff]  ;;  %v273_v1 = vld [vmem:[#allocation6 + $0x8] sm:$0xff] }
  0x1f   :  { %s231_s1 = smov [#allocation7]  }
  0x20   :  { %s135_s4 = sshll.u32 %s231_s1, 4  ;;  %s136_s4 = int_to_ptr.vmem [resolvable:$true] %s135_s4 }
  0x21   :  { %s201_s5 = scalar_lea.vmem %s136_s4, 256  ;;  %p206_p12 = scmp.lt.s32.totalorder %s136_s4, %s136_s4 }
  0x22   :  { %p202_p11 = scmp.ne.s32.totalorder %s136_s4, %s201_s5  ;;  %p207_p13 = scmp.lt.s32.totalorder %s201_s5, %s201_s5 }
  0x24   :  { %v39_v2 = vstv %s35_s30  ;;  %v42_v3 = vstv %s145_s3  ;;  %p208_p0 = por %p207_p13, %p206_p12 }
  0x25   :  { %v40_v4 = vmul.f32 %v39_v2, %v271_v0  ;;  %v41_v5 = vmul.f32 %v39_v2, %v273_v1 }
  0x26   :  { %p209_p1 = pnand %p208_p0, %p202_p11 }
  0x27   :  { %v277_v6 = vadd.f32 %v42_v3, %v40_v4  ;;  %v279_v7 = vsub.f32 %v42_v3, %v40_v4  ;;  %v281_v8 = vadd.f32 %v42_v3, %v41_v5  ;;  %v283_v9 = vsub.f32 %v42_v3, %v41_v5 }
  0x29   :  { %v53_v10 = vand.u32 2147483647, %v277_v6  ;;  %v89_v11 = vand.u32 2147483647, %v279_v7  ;;  %v54_v13 = vand.u32 2147483647, %v281_v8  ;;  %vm49_vm2 = vcmp.ne.f32.partialorder %v277_v6, %v277_v6 }
  0x2a   :  { %v90_v15 = vand.u32 2147483647, %v283_v9  ;;  %v47_v43 = vmax.f32 %v277_v6, 0.0  ;;  %v83_v49 = vmax.f32 %v279_v7, 0.0  ;;  %v48_v54 = vmax.f32 %v281_v8, 0.0 }
  0x2b   :  { %v55_v12 = vsub.f32 0.0, %v53_v10  ;;  %v91_v14 = vsub.f32 0.0, %v89_v11  ;;  %v56_v17 = vsub.f32 0.0, %v54_v13  ;;  %vm85_vm4 = vcmp.ne.f32.partialorder %v279_v7, %v279_v7 }
  0x2c   :  { %v92_v19 = vsub.f32 0.0, %v90_v15  ;;  %v84_v61 = vmax.f32 %v283_v9, 0.0  ;;  %vm50_vm6 = vcmp.ne.f32.partialorder %v281_v8, %v281_v8  ;;  %vm86_vm7 = vcmp.ne.f32.partialorder %v283_v9, %v283_v9 }
  0x2d   :  { %v57_v16 = vmul.f32 1.442695, %v55_v12  ;;  %v93_v18 = vmul.f32 1.442695, %v91_v14  ;;  %v59_v20 = vmul.f32 1.442695, %v56_v17 }
  0x2e   :  { %v95_v21 = vmul.f32 1.442695, %v92_v19 }
  0x2f   :  { %149 = vpow2.f32 %v57_v16 }
  0x30   :  { %151 = vpow2.f32 %v93_v18 }
  0x31   :  { %153 = vpow2.f32 %v59_v20 }
  0x32   :  { %155 = vpow2.f32 %v95_v21 }
  0x39   :  { %v150_v22 = vpop.eup %149 }
  0x3a   :  { %v152_v23 = vpop.eup %151  ;;  %v61_v24 = vadd.f32 1.0, %v150_v22  ;;  %v64_v29 = vmul.f32 -0.5, %v150_v22  ;;  %v67_v35 = vand.u32 2147483647, %v150_v22 }
  0x3b   :  { %v154_v25 = vpop.eup %153  ;;  %v97_v26 = vadd.f32 1.0, %v152_v23  ;;  %v100_v30 = vmul.f32 -0.5, %v152_v23  ;;  %v103_v37 = vand.u32 2147483647, %v152_v23 }
  0x3c   :  { %v156_v27 = vpop.eup %155  ;;  %157 = vlog2.f32 %v61_v24  ;;  %v70_v28 = vadd.f32 1.0, %v154_v25  ;;  %v73_v32 = vmul.f32 -0.5, %v154_v25  ;;  %v65_v33 = vadd.f32 1.0, %v64_v29 }
  0x3d   :  { %159 = vlog2.f32 %v97_v26  ;;  %v106_v31 = vadd.f32 1.0, %v156_v27  ;;  %v109_v34 = vmul.f32 -0.5, %v156_v27  ;;  %v101_v36 = vadd.f32 1.0, %v100_v30 }
  0x3e   :  { %161 = vlog2.f32 %v70_v28  ;;  %v74_v38 = vadd.f32 1.0, %v73_v32  ;;  %v76_v39 = vand.u32 2147483647, %v154_v25  ;;  %v66_v40 = vmul.f32 %v150_v22, %v65_v33 }
  0x3f   :  { %163 = vlog2.f32 %v106_v31  ;;  %v110_v41 = vadd.f32 1.0, %v109_v34  ;;  %vm290_vm0 = vcmp.lt.f32.partialorder %v67_v35, 0.0004427343  ;;  %v102_v45 = vmul.f32 %v152_v23, %v101_v36 }
  0x40   :  { %v112_v46 = vand.u32 2147483647, %v156_v27  ;;  %vm295_vm1 = vcmp.lt.f32.partialorder %v103_v37, 0.0004427343  ;;  %v75_v51 = vmul.f32 %v154_v25, %v74_v38  ;;  %vm77_vm3 = vcmp.lt.f32.partialorder %v76_v39, 0.0004427343 }
  0x41   :  { %v111_v57 = vmul.f32 %v156_v27, %v110_v41 }
  0x42   :  { %vm113_vm5 = vcmp.lt.f32.partialorder %v112_v46, 0.0004427343 }
  0x46   :  { %v158_v42 = vpop.eup %157 }
  0x47   :  { %v160_v47 = vpop.eup %159  ;;  %v63_v48 = vmul.f32 0.6931472, %v158_v42 }
  0x48   :  { %v162_v52 = vpop.eup %161  ;;  %v99_v53 = vmul.f32 0.6931472, %v160_v47 }
  0x49   :  { %v69_v55 = vsel %vm290_vm0, %v66_v40, %v63_v48  ;;  %v72_v56 = vmul.f32 0.6931472, %v162_v52  ;;  %v164_v58 = vpop.eup %163 }
  0x4a   :  { %v79_v59 = vadd.f32 %v69_v55, %v47_v43  ;;  %v105_v60 = vsel %vm295_vm1, %v102_v45, %v99_v53  ;;  %v108_v2 = vmul.f32 0.6931472, %v164_v58 }
  0x4b   :  { %v115_v62 = vadd.f32 %v105_v60, %v83_v49  ;;  %v78_v63 = vsel %vm77_vm3, %v75_v51, %v72_v56 }
  0x4c   :  { %v81_v3 = vsel %vm49_vm2, %v277_v6, %v79_v59  ;;  %v80_v4 = vadd.f32 %v78_v63, %v48_v54  ;;  %v114_v10 = vsel %vm113_vm5, %v111_v57, %v108_v2 }
  0x4d   :  { %v117_v5 = vsel %vm85_vm4, %v279_v7, %v115_v62  ;;  %v116_v13 = vadd.f32 %v114_v10, %v84_v61  ;;  %v119_v16 = vmul.f32 %v81_v3, %v271_v0 }
  0x4e   :  { %v121_v11 = vadd.f32 %v117_v5, %v81_v3  ;;  %v82_v12 = vsel %vm50_vm6, %v281_v8, %v80_v4 }
  0x4f   :  { %v118_v14 = vsel %vm86_vm7, %v283_v9, %v116_v13  ;;  %v120_v6 = vmul.f32 %v82_v12, %v273_v1 }
  0x50   :  { %165 = vrcp.f32 %v121_v11  ;;  %v122_v15 = vadd.f32 %v118_v14, %v82_v12 }
  0x52   :  { %167 = vrcp.f32 %v122_v15 }
  0x5a   :  { %v166_v17 = vpop.eup %165 }
  0x5b   :  { %v124_v18 = vmul.f32 %v166_v17, %v119_v16 }
  0x5c   :  { %v168_v7 = vpop.eup %167 }
  0x5d   :  { %127 = vst [vmem:[#allocation7] sm:$0xff] %v124_v18  ;;  %v126_v19 = vmul.f32 %v168_v7, %v120_v6 }
  0x5f   :  { %128 = vst [vmem:[#allocation7 + $0x8] sm:$0xff] %v126_v19 }
  0x60   :  { %212 = shalt.err (!%p209_p1)
}
  0x61   :  { %s213_s8 = scalar_lea.hbm %s336_s2, 256 }
  0x62   :  { %p214_p2 = scmp.ne.s32.totalorder %s336_s2, %s213_s8  ;;  %p217_p3 = scmp.lt.u32.totalorder %s213_s8, %s336_s2 }
  0x64   :  { %p219_p4 = pnand %p217_p3, %p214_p2 }
  0x66   :  { %222 = shalt.err (!%p219_p4)
}
  0x67   :  { %138 = dma.vmem_to_hbm [thread:$0]  %s136_s4, 256, %s336_s2, [#allocation4]  }
  0x68   :  { %227 = dma.done.wait [#allocation4], 256  }
  0x69   :  { %228 = vsyncadd [#allocation4], 4294967040 }
  0x6a   :  { %142 = vsyncpa [#allocation3], 1 }
  0x6b   :  { %143 = vsyncpa [#allocation4], 1 }
  0x6c   :  { %144 = vsyncpa [#allocation5], 1 }

</bundles_post_ra>
